<compile_context>
chip_gen: v7x
topology: tpu7x:2x2x1
jax: 0.10.0
libtpu: 0.0.40
codegen_flags: <defaults>
</compile_context>

<pallas_src>
import jax
import jax.numpy as jnp
from jax.experimental import pallas as pl
from jax.experimental.pallas import tpu as pltpu

IN_FEATURES = 289
HIDDEN = 12


def _round_up(x, m):
    return ((x + m - 1) // m) * m


def _cdiv(a, b):
    return (a + b - 1) // b


def _choose_tile(batch, tile_b):
    """Pick a batch tile.

    Rules:
      * multiple of 8 (f32 sublane packing),
      * if the grid has >1 tile, a multiple of 128 so the lane-dense (1, tile)
        output block satisfies the (8, 128) BlockSpec constraint,
      * if a single tile suffices, shrink it to just cover the batch.
    """
    tile = _round_up(max(1, min(tile_b, batch)), 8)
    if _cdiv(batch, tile) > 1:
        tile = _round_up(tile, 128)
    if _cdiv(batch, tile) == 1:
        tile = _round_up(batch, 8)
    return tile


def _bgnet_kernel(bl_ref, br_ref, w1_ref, aux_ref, out_ref):
    # bl_ref / br_ref : (tile, 289)  incoming dtype (f32)
    # w1_ref          : (289, 12)    compute dtype (bf16 or f32)
    # aux_ref         : (16, 12)     f32; rows 0..7 = b1 (replicated),
    #                                     rows 8..15 = w2 row (replicated)
    # out_ref         : (1, tile)    f32  (lane-dense row slab)
    cd = w1_ref.dtype
    w1 = w1_ref[...]
    b1 = aux_ref[0:1, :]          # (1, 12)  f32
    w2 = aux_ref[8:16, :]         # (8, 12)  f32  (identical rows)

    # ---- shared trunk: two MXU dots sharing resident W1, f32 accumulation ----
    # In-kernel cast to the compute dtype happens on the VPU (free slot); the
    # boards are read from HBM exactly once, in their incoming dtype.
    h_l = jnp.dot(bl_ref[...].astype(cd), w1, preferred_element_type=jnp.float32)
    h_r = jnp.dot(br_ref[...].astype(cd), w1, preferred_element_type=jnp.float32)

    # ---- folded antisymmetric head (fc_out bias cancels) ---------------------
    d = jnp.maximum(h_l + b1, 0.0) - jnp.maximum(h_r + b1, 0.0)      # (tile, 12)

    # (8, 12) @ (tile, 12)^T -> (8, tile): tiny MXU contraction that lands the
    # result lane-dense (batch along lanes); rows are identical, use row 0.
    diff = jnp.einsum("oh,th->ot", w2, d,
                      preferred_element_type=jnp.float32)            # (8, tile)
    out_ref[...] = jax.nn.sigmoid(diff[0:1, :]).astype(out_ref.dtype)


def bgnet_forward(board_left, board_right, w1, b1, w2, b2=None, *,
                  tile_b=2048, compute_dtype=jnp.bfloat16):
    # b2 is accepted for API parity with the torch module but is mathematically
    # dead: it cancels inside out_left + out_right.
    del b2
    batch, feat = board_left.shape
    assert feat == IN_FEATURES and board_right.shape == (batch, feat)

    tile = _choose_tile(batch, tile_b)
    n_tiles = _cdiv(batch, tile)
    total = n_tiles * tile

    # Tiny parameter arrays only (no full-board passes in the wrapper).
    w1c = w1.reshape(IN_FEATURES, HIDDEN).astype(compute_dtype)
    aux = jnp.concatenate(
        [jnp.broadcast_to(b1.reshape(1, HIDDEN).astype(jnp.float32), (8, HIDDEN)),
         jnp.broadcast_to(w2.reshape(1, HIDDEN).astype(jnp.float32), (8, HIDDEN))],
        axis=0)                                                       # (16, 12) f32

    board_spec = pl.BlockSpec((tile, IN_FEATURES), lambda i: (i, 0))
    board_bytes = jnp.dtype(board_left.dtype).itemsize

    cost = pl.CostEstimate(
        flops=(2 * 2 * total * IN_FEATURES * HIDDEN      # trunk matmuls
               + 6 * total * HIDDEN),                     # bias/relu/sub + head
        transcendentals=total,                            # sigmoid exp
        bytes_accessed=(2 * total * IN_FEATURES * board_bytes   # boards
                        + total * 4                             # output
                        + IN_FEATURES * HIDDEN * jnp.dtype(compute_dtype).itemsize
                        + 16 * HIDDEN * 4),
    )

    out = pl.pallas_call(
        _bgnet_kernel,
        out_shape=jax.ShapeDtypeStruct((1, total), jnp.float32),
        grid=(n_tiles,),
        in_specs=[
            board_spec,                                              # board_left tile
            board_spec,                                              # board_right tile
            pl.BlockSpec((IN_FEATURES, HIDDEN), lambda i: (0, 0)),   # W1 (resident)
            pl.BlockSpec((16, HIDDEN), lambda i: (0, 0)),            # b1 + w2 (resident)
        ],
        out_specs=pl.BlockSpec((1, tile), lambda i: (0, i)),         # lane-dense row slab
        compiler_params=pltpu.CompilerParams(
            dimension_semantics=("parallel",)),   # shard tiles across TCs on v7x
        cost_estimate=cost,
    )(board_left, board_right, w1c, aux)

    # Drop padded/ragged tail rows (their inputs were unspecified padding).
    return out.reshape(-1)[:batch].reshape(batch, 1)


def init_params(key):
    """Deterministic init mimicking torch.nn.Linear default U(-1/sqrt(fan_in), +)."""
    k1, k2, k3, k4 = jax.random.split(key, 4)
    lim1 = 1.0 / jnp.sqrt(jnp.float32(IN_FEATURES))
    lim2 = 1.0 / jnp.sqrt(jnp.float32(HIDDEN))
    # Stored transposed relative to torch: (in_features, out_features).
    w1 = jax.random.uniform(k1, (IN_FEATURES, HIDDEN), jnp.float32, -lim1, lim1)
    b1 = jax.random.uniform(k2, (1, HIDDEN), jnp.float32, -lim1, lim1)
    w2 = jax.random.uniform(k3, (HIDDEN, 1), jnp.float32, -lim2, lim2)
    b2 = jax.random.uniform(k4, (1, 1), jnp.float32, -lim2, lim2)
    return w1, b1, w2, b2


def bgnet_reference(board_left, board_right, w1, b1, w2, b2):
    """Pure-JAX f32 reference with the same math as the torch module."""
    h_l = jax.nn.relu(board_left @ w1 + b1)
    h_r = jax.nn.relu(board_right @ w1 + b1)
    out_l = h_l @ w2 + b2
    out_r = -(h_r @ w2 + b2)
    return jax.nn.sigmoid(out_l + out_r)


if __name__ == "__main__":
    key = jax.random.PRNGKey(0)
    k_params, k_l, k_r, k_l2, k_r2 = jax.random.split(key, 5)
    w1, b1, w2, b2 = init_params(k_params)

    # --- small batch, single tile ---------------------------------------------
    batch = 8
    bl = jax.random.normal(k_l, (batch, IN_FEATURES), jnp.float32)
    br = jax.random.normal(k_r, (batch, IN_FEATURES), jnp.float32)
    ref = bgnet_reference(bl, br, w1, b1, w2, b2)

    # Default (bf16 trunk compute, f32 accumulation).
    out = jax.block_until_ready(bgnet_forward(bl, br, w1, b1, w2, b2))
    assert out.shape == (batch, 1)
    assert jnp.allclose(out, ref, atol=8e-3, rtol=0.0)

    # f32-parity path.
    out_f32 = jax.block_until_ready(
        bgnet_forward(bl, br, w1, b1, w2, b2, compute_dtype=jnp.float32))
    assert jnp.allclose(out_f32, ref, atol=2e-3, rtol=0.0)

    # --- multi-tile grid + ragged last block (no jnp.pad anywhere) -------------
    batch2 = 300
    bl2 = jax.random.normal(k_l2, (batch2, IN_FEATURES), jnp.float32)
    br2 = jax.random.normal(k_r2, (batch2, IN_FEATURES), jnp.float32)
    out2 = jax.block_until_ready(
        bgnet_forward(bl2, br2, w1, b1, w2, b2, tile_b=128))   # 3 tiles, ragged tail
    ref2 = bgnet_reference(bl2, br2, w1, b1, w2, b2)
    assert out2.shape == (batch2, 1)
    assert jnp.allclose(out2, ref2, atol=8e-3, rtol=0.0)

    print("KERNEL_OK")
</pallas_src>

<mosaic_0001>
module attributes {stable_mosaic.version = 11 : i64} {
  func.func @_bgnet_kernel(%arg0: i32, %arg1: memref<8x289xf32, #tpu.memory_space<vmem>>, %arg2: memref<8x289xf32, #tpu.memory_space<vmem>>, %arg3: memref<289x12xbf16, #tpu.memory_space<vmem>>, %arg4: memref<16x12xf32, #tpu.memory_space<vmem>>, %arg5: memref<1x8xf32, #tpu.memory_space<vmem>>) attributes {dimension_semantics = [#tpu.dimension_semantics<parallel>], iteration_bounds = array<i64: 1>, scalar_prefetch = 0 : i64, scratch_operands = 0 : i64, tpu.core_type = #tpu.core_type<tc>, window_params = [{transform_indices = @transform_0, window_bounds = array<i64: 8, 289>}, {transform_indices = @transform_1, window_bounds = array<i64: 8, 289>}, {pipeline_mode = #tpu.pipeline_mode<synchronous>, transform_indices = @transform_2, window_bounds = array<i64: 289, 12>}, {pipeline_mode = #tpu.pipeline_mode<synchronous>, transform_indices = @transform_3, window_bounds = array<i64: 16, 12>}, {transform_indices = @transform_4, window_bounds = array<i64: 1, 8>}]} {
    %c0 = arith.constant 0 : index
    %c0_0 = arith.constant 0 : index
    %0 = vector.load %arg3[%c0, %c0_0] : memref<289x12xbf16, #tpu.memory_space<vmem>>, vector<289x12xbf16>
    %c0_1 = arith.constant 0 : index
    %c0_2 = arith.constant 0 : index
    %1 = vector.load %arg4[%c0_1, %c0_2] : memref<16x12xf32, #tpu.memory_space<vmem>>, vector<1x12xf32>
    %c8 = arith.constant 8 : index
    %c0_3 = arith.constant 0 : index
    %2 = vector.load %arg4[%c8, %c0_3] : memref<16x12xf32, #tpu.memory_space<vmem>>, vector<8x12xf32>
    %c0_4 = arith.constant 0 : index
    %c0_5 = arith.constant 0 : index
    %3 = vector.load %arg1[%c0_4, %c0_5] : memref<8x289xf32, #tpu.memory_space<vmem>>, vector<8x289xf32>
    %4 = arith.truncf %3 : vector<8x289xf32> to vector<8x289xbf16>
    %cst = arith.constant dense<0.000000e+00> : vector<8x12xf32>
    %5 = tpu.matmul %4, %0, %cst {dimension_numbers = #tpu.dot_dimension_numbers<[1], [0], [0], [1], [0, 0, 1, 1], [], []>} : vector<8x289xbf16>, vector<289x12xbf16>, vector<8x12xf32> -> vector<8x12xf32>
    %c0_6 = arith.constant 0 : index
    %c0_7 = arith.constant 0 : index
    %6 = vector.load %arg2[%c0_6, %c0_7] : memref<8x289xf32, #tpu.memory_space<vmem>>, vector<8x289xf32>
    %7 = arith.truncf %6 : vector<8x289xf32> to vector<8x289xbf16>
    %cst_8 = arith.constant dense<0.000000e+00> : vector<8x12xf32>
    %8 = tpu.matmul %7, %0, %cst_8 {dimension_numbers = #tpu.dot_dimension_numbers<[1], [0], [0], [1], [0, 0, 1, 1], [], []>} : vector<8x289xbf16>, vector<289x12xbf16>, vector<8x12xf32> -> vector<8x12xf32>
    %9 = vector.broadcast %1 : vector<1x12xf32> to vector<8x12xf32>
    %10 = arith.addf %5, %9 : vector<8x12xf32>
    %cst_9 = arith.constant 0.000000e+00 : f32
    %11 = vector.broadcast %cst_9 : f32 to vector<8x12xf32>
    %12 = arith.maximumf %10, %11 : vector<8x12xf32>
    %13 = vector.broadcast %1 : vector<1x12xf32> to vector<8x12xf32>
    %14 = arith.addf %8, %13 : vector<8x12xf32>
    %cst_10 = arith.constant 0.000000e+00 : f32
    %15 = vector.broadcast %cst_10 : f32 to vector<8x12xf32>
    %16 = arith.maximumf %14, %15 : vector<8x12xf32>
    %17 = arith.subf %12, %16 : vector<8x12xf32>
    "tpu.trace_start"() <{level = 10 : i32, message = "oh,th->ot"}> : () -> ()
    %cst_11 = arith.constant dense<0.000000e+00> : vector<8x8xf32>
    %18 = tpu.matmul %2, %17, %cst_11 {dimension_numbers = #tpu.dot_dimension_numbers<[1], [1], [0], [0], [0, 0, 1, 0], [], []>} : vector<8x12xf32>, vector<8x12xf32>, vector<8x8xf32> -> vector<8x8xf32>
    "tpu.trace_stop"() : () -> ()
    %19 = vector.extract_strided_slice %18 {offsets = [0, 0], sizes = [1, 8], strides = [1, 1]} : vector<8x8xf32> to vector<1x8xf32>
    %20 = arith.negf %19 : vector<1x8xf32>
    %21 = math.exp %20 : vector<1x8xf32>
    %cst_12 = arith.constant 1.000000e+00 : f32
    %22 = vector.broadcast %cst_12 : f32 to vector<1x8xf32>
    %23 = arith.addf %22, %21 : vector<1x8xf32>
    %24 = arith.divf %22, %23 : vector<1x8xf32>
    %c0_13 = arith.constant 0 : index
    %c0_14 = arith.constant 0 : index
    %25 = vector.load %arg5[%c0_13, %c0_14] : memref<1x8xf32, #tpu.memory_space<vmem>>, vector<1x8xf32>
    tpu.vector_store %arg5[%c0_13, %c0_14], %24 {strides = array<i32>} : memref<1x8xf32, #tpu.memory_space<vmem>>, vector<1x8xf32>,
    return
  }
  func.func @transform_0(%arg0: i32) -> (i32, i32) {
    %c0_i32 = arith.constant 0 : i32
    %c0_i32_0 = arith.constant 0 : i32
    return %arg0, %c0_i32 : i32, i32
  }
  func.func @transform_1(%arg0: i32) -> (i32, i32) {
    %c0_i32 = arith.constant 0 : i32
    %c0_i32_0 = arith.constant 0 : i32
    return %arg0, %c0_i32 : i32, i32
  }
  func.func @transform_2(%arg0: i32) -> (i32, i32) {
    %c0_i32 = arith.constant 0 : i32
    %c0_i32_0 = arith.constant 0 : i32
    %c0_i32_1 = arith.constant 0 : i32
    return %c0_i32, %c0_i32_0 : i32, i32
  }
  func.func @transform_3(%arg0: i32) -> (i32, i32) {
    %c0_i32 = arith.constant 0 : i32
    %c0_i32_0 = arith.constant 0 : i32
    %c0_i32_1 = arith.constant 0 : i32
    return %c0_i32, %c0_i32_0 : i32, i32
  }
  func.func @transform_4(%arg0: i32) -> (i32, i32) {
    %c0_i32 = arith.constant 0 : i32
    %c0_i32_0 = arith.constant 0 : i32
    return %c0_i32, %arg0 : i32, i32
  }
}

</mosaic_0001>

<bundles_post_ra>
// kernel: tpu_custom_call.1
= control target key start
LH: loop header
LB: loop body
LE: loop exit
PB: predicated region body
PF: predicated region fallthrough
CT: control target
= control target key end

     0   :  { %v615_v1 = vmov 0.0   ;;  %vm189_vm0 = vcmask 1040384   ;;  %vm616_vm1 = vmmov 0   ;;  %v617_v8 = vmov 0   ;;  %s760_s0 = inlined_call_operand.vmem [shape: f32[8,289], index: 0, kind: input, shape index: {}]   ;;  %s761_s1 = inlined_call_operand.vmem [shape: f32[8,289], index: 1, kind: input, shape index: {}]   ;;  %s762_s2 = inlined_call_operand.vmem [shape: bf16[289,12], index: 2, kind: input, shape index: {}]   ;;  %s763_s3 = inlined_call_operand.vmem [shape: f32[16,12], index: 3, kind: input, shape index: {}]   ;;  %s764_s4 = inlined_call_operand.hbm [shape: f32[1,8], index: 4, kind: output, shape index: {}]  }
   0x1   :  { %v568_v0 = vld [vmem:[%s762_s2 + $0x40] sm:$0xff]   ;;  %539 = vmatprep.subr.bf16.mxu1 %v615_v1  ;;  %v571_v4 = vld [vmem:[%s762_s2 + $0x48] sm:$0xff]   ;;  %545 = vmatprep.mubr.msk.bf16.mxu1 %vm616_vm1, %v615_v1  ;;  %v574_v7 = vld [vmem:[%s762_s2 + $0x50] sm:$0xff]   ;;  %v191_v9 = vsel %vm189_vm0, 65535, %v617_v8  ;;  %vm185_vm2 = vcmask 269312  }
   0x2   :  { %v651_v2 = vld [vmem:[%s762_s2 + $0x80] sm:$0xff]   ;;  %485 = vmatprep.subr.bf16.mxu0 %v568_v0  ;;  %v664_v5 = vld [vmem:[%s762_s2 + $0x88] sm:$0xff]   ;;  %v575_v10 = vld [vmem:[%s762_s2 + $0x90] ss:$0 sps:$4 sm:$0x11]  }
   0x3   :  { %v570_v3 = vld [vmem:[%s762_s2] sm:$0xff]   ;;  %540 = vmatpush3.bf16.msra.mxu1 %v651_v2  ;;  %v573_v6 = vld [vmem:[%s762_s2 + $0x8] sm:$0xff]   ;;  %v576_v11 = vld [vmem:[%s762_s2 + $0x10] sm:$0xff]   ;;  %v193_v13 = vand.u32 %v575_v10, %v191_v9 }
   0x4   :  { %486 = vmatpush3.bf16.msra.mxu0 %v570_v3  ;;  %541 = vmatprep.subr.bf16.mxu1 %v615_v1  ;;  %v60_v12 = vld [vmem:[%s760_s0 + $0x10] sm:$0xff]  ;;  %v577_v14 = vld [vmem:[%s762_s2 + $0x58] sm:$0xff]   ;;  %v579_v17 = vld [vmem:[%s762_s2 + $0x60] sm:$0xff]  }
   0x5   :  { %487 = vmatprep.subr.bf16.mxu0 %v571_v4  ;;  %v63_v15 = vpack.c.bf16 %v60_v12, %v60_v12  ;;  %v578_v16 = vld [vmem:[%s762_s2 + $0x18] sm:$0xff]   ;;  %v580_v18 = vld [vmem:[%s762_s2 + $0x20] sm:$0xff]   ;;  %v581_v19 = vld [vmem:[%s762_s2 + $0x68] sm:$0xff]  }
   0x6   :  { %v59_v20 = vld [vmem:[%s760_s0 + $0x8] sm:$0xff] }
   0x7   :  { %542 = vmatpush3.bf16.msra.mxu1 %v664_v5  ;;  %v65_v21 = vld [vmem:[%s761_s1 + $0x8] sm:$0xff]  ;;  %v62_v23 = vpack.c.bf16 %v59_v20, %v59_v20 }
   0x8   :  { %488 = vmatpush3.bf16.msra.mxu0 %v573_v6  ;;  %543 = vmatprep.subr.bf16.mxu1 %v615_v1  ;;  %v582_v22 = vld [vmem:[%s762_s2 + $0x28] sm:$0xff]   ;;  %v68_v24 = vpack.c.bf16 %v65_v21, %v65_v21 }
   0x9   :  { %489 = vmatprep.subr.bf16.mxu0 %v574_v7 }
   0xb   :  { %544 = vmatpush3.bf16.msra.mxu1 %v193_v13 }
   0xc   :  { %490 = vmatpush3.bf16.msra.mxu0 %v576_v11  ;;  %511 = vmatprep.subr.bf16.mxu1 %v568_v0 }
   0xd   :  { %491 = vmatprep.subr.bf16.mxu0 %v577_v14 }
   0xe   :  { %546 = vmatmul.mubr.msk.bf16.vlgmr.msra.gmra.mrb[0].mxu1 %vm185_vm2, %v63_v15 }
   0xf   :  { %512 = vmatpush3.bf16.msra.mxu1 %v570_v3 }
  0x10   :  { %492 = vmatpush3.bf16.msra.mxu0 %v578_v16  ;;  %513 = vmatprep.subr.bf16.mxu1 %v571_v4 }
  0x11   :  { %493 = vmatprep.subr.bf16.mxu0 %v579_v17 }
  0x13   :  { %514 = vmatpush3.bf16.msra.mxu1 %v573_v6 }
  0x14   :  { %494 = vmatpush3.bf16.msra.mxu0 %v580_v18  ;;  %515 = vmatprep.subr.bf16.mxu1 %v574_v7 }
  0x15   :  { %9 = vsyncpa [#allocation3], 0  ;;  %495 = vmatprep.subr.bf16.mxu0 %v581_v19  ;;  %v583_v25 = vld [vmem:[%s762_s2 + $0x70] sm:$0xff]   ;;  %227 = vmatprep.mubr.bf16.mxu0 %v62_v23  ;;  %v585_v27 = vld [vmem:[%s762_s2 + $0x78] sm:$0xff]   ;;  %vm361_vm3 = vcmask 97280   ;;  %s618_s14 = smov [#allocation2]  }
  0x16   :  { %311 = vmatprep.mubr.bf16.mxu1 %v68_v24  ;;  %v584_v26 = vld [vmem:[%s762_s2 + $0x30] sm:$0xff]   ;;  %v586_v28 = vld [vmem:[%s762_s2 + $0x38] sm:$0xff]   ;;  %v58_v29 = vld [vmem:[%s760_s0] sm:$0xff]  ;;  %s452_s15 = sshll.u32 %s618_s14, 4  ;;  %vm444_vm4 = vcmask 57344   ;;  %s453_s15 = int_to_ptr.vmem [resolvable:$true] %s452_s15 }
  0x17   :  { %516 = vmatpush3.bf16.msra.mxu1 %v576_v11  ;;  %v61_v30 = vpack.c.bf16 %v58_v29, %v58_v29  ;;  %v64_v31 = vld [vmem:[%s761_s1] sm:$0xff]  ;;  %v66_v32 = vld [vmem:[%s761_s1 + $0x10] sm:$0xff]  ;;  %v57_v61 = vld [vmem:[%s763_s3 + $0x8] sm:$0xff]  ;;  %s591_s16 = scalar_lea.vmem %s453_s15, 16  ;;  %s595_s17 = scalar_lea.vmem %s453_s15, 32 }
  0x18   :  { %496 = vmatpush3.bf16.msra.mxu0 %v582_v22  ;;  %517 = vmatprep.subr.bf16.mxu1 %v577_v14  ;;  %v67_v33 = vpack.c.bf16 %v64_v31, %v64_v31  ;;  %v69_v34 = vpack.c.bf16 %v66_v32, %v66_v32  ;;  %v460_v40 = vld [vmem:[%s763_s3] ss:$0 sm:$0xff]  ;;  %p592_p0 = scmp.ne.s32.totalorder %s453_s15, %s591_s16  ;;  %p596_p1 = scmp.lt.s32.totalorder %s453_s15, %s453_s15 }
  0x19   :  { %497 = vmatprep.subr.bf16.mxu0 %v583_v25  ;;  %p597_p2 = scmp.lt.s32.totalorder %s595_s17, %s591_s16 }
  0x1b   :  { %518 = vmatpush3.bf16.msra.mxu1 %v578_v16  ;;  %p598_p3 = por %p597_p2, %p596_p1 }
  0x1c   :  { %498 = vmatpush3.bf16.msra.mxu0 %v584_v26  ;;  %519 = vmatprep.subr.bf16.mxu1 %v579_v17 }
  0x1d   :  { %499 = vmatprep.subr.bf16.mxu0 %v585_v27  ;;  %p599_p4 = pnand %p598_p3, %p592_p0 }
  0x1f   :  { %520 = vmatpush3.bf16.msra.mxu1 %v580_v18 }
  0x20   :  { %500 = vmatpush3.bf16.msra.mxu0 %v586_v28  ;;  %521 = vmatprep.subr.bf16.mxu1 %v581_v19 }
  0x21   :  { %549 = vmatprep.subr.bf16.mxu0 %v615_v1 }
  0x23   :  { %228 = vmatmul.mubr.bf16.vlgmr.msra.gmra.mrb[0].mxu0 %v61_v30  ;;  %522 = vmatpush3.bf16.msra.mxu1 %v582_v22 }
  0x24   :  { %550 = vmatpush3.bf16.msra.mxu0 %v651_v2  ;;  %523 = vmatprep.subr.bf16.mxu1 %v583_v25 }
  0x25   :  { %551 = vmatprep.subr.bf16.mxu0 %v615_v1  ;;  %555 = vmatprep.mubr.msk.bf16.mxu0 %vm616_vm1, %v615_v1 }
  0x27   :  { %524 = vmatpush3.bf16.msra.mxu1 %v584_v26 }
  0x28   :  { %552 = vmatpush3.bf16.msra.mxu0 %v664_v5  ;;  %525 = vmatprep.subr.bf16.mxu1 %v585_v27 }
  0x29   :  { %553 = vmatprep.subr.bf16.mxu0 %v615_v1 }
  0x2b   :  { %526 = vmatpush3.bf16.msra.mxu1 %v586_v28 }
  0x2c   :  { %554 = vmatpush3.bf16.msra.mxu0 %v193_v13 }
  0x2d   :  { %559 = vmatprep.subr.mxu0 %v615_v1 }
  0x2e   :  { %312 = vmatmul.mubr.bf16.vlgmr.msra.gmra.mrb[4].mxu1 %v67_v33 }
  0x2f   :  { %556 = vmatmul.mubr.msk.bf16.vlgmr.msra.gmra.mrb[4].mxu0 %vm185_vm2, %v69_v34 }
  0x30   :  { %561 = vmatprep.mubr.msk.f32.mxu0 %vm616_vm1, %v615_v1 }
  0xe1   :  { %v269_v35 = vpop.f32.mrb[0].mxu1 }
  0xe2   :  { %v547_v36 = vpop.f32.mrb[1].mxu1 }
  0xe3   :  { %v272_v37 = vpop.f32.mrb[2].mxu1 }
  0xe4   :  { %v548_v38 = vpop.f32.mrb[3].mxu1 }
  0xf6   :  { %v501_v39 = vpop.f32.mrb[0].mxu0 }
  0xf7   :  { %v502_v41 = vpop.f32.mrb[1].mxu0 }
  0xf8   :  { %v503_v42 = vadd.f32 %v502_v41, %v501_v39  ;;  %v504_v43 = vpop.f32.mrb[2].mxu0 }
  0xf9   :  { %v505_v44 = vpop.f32.mrb[3].mxu0 }
  0xfa   :  { %v230_v45 = vadd.f32 %v503_v42, %v460_v40 }
  0xfc   :  { %v270_v46 = vadd.f32 %v269_v35, %v230_v45 }
  0xfe   :  { %v275_v58 = vmax.f32 %v270_v46, 0.0 }
 0x101   :  { %v527_v47 = vpop.f32.mrb[4].mxu1 }
 0x102   :  { %v528_v48 = vpop.f32.mrb[5].mxu1  ;;  %v353_v49 = vpop.f32.mrb[4].mxu0 }
 0x103   :  { %v529_v50 = vadd.f32 %v528_v48, %v527_v47  ;;  %v530_v51 = vpop.f32.mrb[6].mxu1  ;;  %v557_v52 = vpop.f32.mrb[5].mxu0 }
 0x104   :  { %v531_v53 = vpop.f32.mrb[7].mxu1  ;;  %v356_v54 = vpop.f32.mrb[6].mxu0 }
 0x105   :  { %v314_v55 = vadd.f32 %v529_v50, %v460_v40  ;;  %v558_v56 = vpop.f32.mrb[7].mxu0 }
 0x107   :  { %v354_v57 = vadd.f32 %v353_v49, %v314_v55 }
 0x109   :  { %v359_v59 = vmax.f32 %v354_v57, 0.0 }
 0x10b   :  { %v360_v60 = vsub.f32 %v275_v58, %v359_v59 }
 0x10d   :  { %560 = vmatpush3.xpose.msk.msra.mxu0 %vm361_vm3, %v360_v60 }
 0x110   :  { %562 = vmatmul.mubr.msk.f32.vlgmr.msra.gmra.mrb[8].mxu0 %vm361_vm3, %v57_v61 }
 0x1e3   :  { %v434_v62 = vpop.f32.mrb[8].mxu0 }
 0x1e4   :  { %v484_v63 = vmul.f32 -1.442695, %v434_v62  ;;  %v563_v0 = vpop.f32.mrb[9].mxu0 }
 0x1e6   :  { %587 = vpow2.f32 %v484_v63 }
 0x1f0   :  { %v588_v1 = vpop.eup %587 }
 0x1f1   :  { %v441_v2 = vadd.f32 1.0, %v588_v1 }
 0x1f3   :  { %589 = vrcp.f32 %v441_v2 }
 0x1fd   :  { %v590_v3 = vpop.eup %589 }
 0x1fe   :  { %445 = vst.msk [vmem:[#allocation2] sm:$0x1] %vm444_vm4, %v590_v3 }
 0x1ff   :  { %602 = shalt.err (!%p599_p4)
}
 0x200   :  { %s603_s19 = scalar_lea.hbm %s764_s4, 16 }
 0x201   :  { %p604_p5 = scmp.ne.s32.totalorder %s764_s4, %s603_s19  ;;  %p607_p6 = scmp.lt.u32.totalorder %s603_s19, %s764_s4 }
 0x203   :  { %p609_p7 = pnand %p607_p6, %p604_p5 }
 0x205   :  { %612 = shalt.err (!%p609_p7)
}
 0x206   :  { %455 = dma.vmem_to_hbm [thread:$0]  %s453_s15, 16, %s764_s4, [#allocation3]  }
 0x207   :  { %613 = dma.done.wait [#allocation3], 16  }
 0x208   :  { %614 = vsyncadd [#allocation3], 4294967280 }
 0x209   :  { %459 = vsyncpa [#allocation3], 1 }

</bundles_post_ra>
